<compile_context>
chip_gen: v7x
topology: tpu7x:2x2x1
jax: 0.10.0
libtpu: 0.0.40
codegen_flags: <defaults>
</compile_context>

<pallas_src>
import jax
import jax.numpy as jnp
from jax.experimental import pallas as pl
from jax.experimental.pallas import tpu as pltpu

EPS = 1e-5          # PyTorch BatchNorm1d default eps
HIDDEN = 64
NUM_CLASSES = 6
H_PAD = 128         # lane-dense hidden width (and internal width of the last matmul)
OUT_PAD = 8         # narrow HBM output width (NUM_CLASSES rounded up to 8 sublanes-friendly)


def _round_up(n, m):
    return ((n + m - 1) // m) * m


# ----------------------------------------------------------------------------
# Kernel: x @ W1 + b1 -> relu -> @ W2' + b2' -> relu -> @ W3' + b3'
# (BatchNorms pre-folded into W2/W3; Dropout(p=0.01) is identity in eval mode.)
# TODO(synk): training-mode dropout mask and batch-statistic BatchNorm are
# intentionally not implemented; eval-mode semantics only.
# ----------------------------------------------------------------------------
def book_classification_kernel(x_ref, w1_ref, w2_ref, w3_ref, bias_ref, o_ref):
    bias = bias_ref[...]                 # (3, 128) f32: rows = b1, b2', b3'
    b1 = bias[0:1, :]
    b2 = bias[1:2, :]
    b3 = bias[2:3, :]

    x = x_ref[...].astype(jnp.bfloat16)  # (TB, D)

    h = jnp.dot(x, w1_ref[...], preferred_element_type=jnp.float32) + b1
    h = jnp.maximum(h, 0.0)

    h = jnp.dot(h.astype(jnp.bfloat16), w2_ref[...],
                preferred_element_type=jnp.float32) + b2
    h = jnp.maximum(h, 0.0)

    logits = jnp.dot(h.astype(jnp.bfloat16), w3_ref[...],
                     preferred_element_type=jnp.float32) + b3    # (TB, 128)
    # Store only the narrow (8-lane) output slab; lanes >= NUM_CLASSES are zero
    # because W3/b3 padding columns are zero.
    o_ref[...] = logits[:, :o_ref.shape[-1]].astype(o_ref.dtype)


# ----------------------------------------------------------------------------
# Wrapper
# ----------------------------------------------------------------------------
def book_classification_forward(x, packed, *, tb=4096):
    """x: (B, input_size) f32. packed: output of pack_params. Returns (B, 6) f32."""
    B, D = x.shape
    Bp = _round_up(B, 8)                 # pad batch to a sublane multiple only
    if Bp != B:
        x = jnp.pad(x, ((0, Bp - B), (0, 0)))

    TB = min(tb, Bp)                     # batch tile (multiple of 8 sublanes)
    # v7x megacore: for mid/large batches make sure there are >= 2 grid steps
    # so dimension_semantics=("parallel",) shards work across both TensorCores.
    if TB == Bp and Bp >= 1024:
        TB = _round_up(pl.cdiv(Bp, 2), 8)
    grid = (pl.cdiv(Bp, TB),)            # partial tail tile handled by Pallas

    out = pl.pallas_call(
        book_classification_kernel,
        out_shape=jax.ShapeDtypeStruct((Bp, OUT_PAD), jnp.float32),
        grid=grid,
        in_specs=[
            pl.BlockSpec((TB, D), lambda i: (i, 0)),               # activations
            pl.BlockSpec(packed["w1"].shape, lambda i: (0, 0)),    # resident weights
            pl.BlockSpec(packed["w2"].shape, lambda i: (0, 0)),
            pl.BlockSpec(packed["w3"].shape, lambda i: (0, 0)),
            pl.BlockSpec(packed["bias"].shape, lambda i: (0, 0)),  # packed biases
        ],
        out_specs=pl.BlockSpec((TB, OUT_PAD), lambda i: (i, 0)),
        compiler_params=pltpu.CompilerParams(
            dimension_semantics=("parallel",),
            vmem_limit_bytes=32 * 1024 * 1024),   # headroom over v5e's 16 MiB default
    )(x, packed["w1"], packed["w2"], packed["w3"], packed["bias"])

    # Nearly free now: re-reads only the narrow (Bp, 8) buffer.
    return out[:B, :NUM_CLASSES]


def pack_params(p, input_size, hidden=HIDDEN, out=NUM_CLASSES, h_pad=H_PAD):
    """Fold eval-mode BatchNorms into the following Linears, zero-pad to
    lane-dense shapes, pack biases, and cast weights to bf16."""
    s1 = p["g1"] * jax.lax.rsqrt(p["v1"] + EPS)     # (1, hidden)
    t1 = p["be1"] - p["m1"] * s1
    s2 = p["g2"] * jax.lax.rsqrt(p["v2"] + EPS)
    t2 = p["be2"] - p["m2"] * s2

    w1 = p["w1"]                     # (in, hidden)
    b1 = p["b1"]                     # (1, hidden)
    w2 = s1.T * p["w2"]              # diag(s1) @ W2      (BN1 folded)
    b2 = t1 @ p["w2"] + p["b2"]
    w3 = s2.T * p["w3"]              # diag(s2) @ W3      (BN2 folded)
    b3 = t2 @ p["w3"] + p["b3"]

    def pad2(a, r, c):
        return jnp.pad(a, ((0, r - a.shape[0]), (0, c - a.shape[1])))

    # All bias rows are packed at width h_pad (the padded-matmul width); the
    # kernel narrows to OUT_PAD only at the final store.
    assert h_pad >= hidden and h_pad >= out, "bias packing assumes h_pad >= hidden, out"

    return {
        "w1": pad2(w1, input_size, h_pad).astype(jnp.bfloat16),
        "w2": pad2(w2, h_pad, h_pad).astype(jnp.bfloat16),
        "w3": pad2(w3, h_pad, h_pad).astype(jnp.bfloat16),
        "bias": jnp.concatenate(
            [pad2(b1, 1, h_pad), pad2(b2, 1, h_pad), pad2(b3, 1, h_pad)],
            axis=0).astype(jnp.float32),                       # (3, 128)
    }


# ----------------------------------------------------------------------------
# References
# ----------------------------------------------------------------------------
def reference_forward(x, p):
    """Original (unfolded) fp32 eval-mode semantics of the PyTorch module."""
    h = jnp.maximum(x @ p["w1"] + p["b1"], 0.0)
    h = (h - p["m1"]) * jax.lax.rsqrt(p["v1"] + EPS) * p["g1"] + p["be1"]
    h = jnp.maximum(h @ p["w2"] + p["b2"], 0.0)
    h = (h - p["m2"]) * jax.lax.rsqrt(p["v2"] + EPS) * p["g2"] + p["be2"]
    return h @ p["w3"] + p["b3"]      # dropout is identity in eval mode


def folded_reference(x, packed, num_classes=NUM_CLASSES):
    """Same folded/bf16 arithmetic as the kernel, in pure JAX."""
    bias = packed["bias"]
    h = jnp.dot(x.astype(jnp.bfloat16), packed["w1"],
                preferred_element_type=jnp.float32) + bias[0:1]
    h = jnp.maximum(h, 0.0)
    h = jnp.dot(h.astype(jnp.bfloat16), packed["w2"],
                preferred_element_type=jnp.float32) + bias[1:2]
    h = jnp.maximum(h, 0.0)
    o = jnp.dot(h.astype(jnp.bfloat16), packed["w3"],
                preferred_element_type=jnp.float32) + bias[2:3]
    return o[:, :num_classes]


def init_params(key, input_size, hidden=HIDDEN, out=NUM_CLASSES):
    ks = jax.random.split(key, 12)
    u = lambda k, shape, s: jax.random.uniform(k, shape, jnp.float32, -s, s)
    return {
        # Linear weights stored as (in, out)  (PyTorch stores (out, in))
        "w1": u(ks[0], (input_size, hidden), 1.0 / jnp.sqrt(input_size)),
        "b1": u(ks[1], (1, hidden), 1.0 / jnp.sqrt(input_size)),
        "w2": u(ks[2], (hidden, hidden), 1.0 / jnp.sqrt(hidden)),
        "b2": u(ks[3], (1, hidden), 1.0 / jnp.sqrt(hidden)),
        "w3": u(ks[4], (hidden, out), 1.0 / jnp.sqrt(hidden)),
        "b3": u(ks[5], (1, out), 1.0 / jnp.sqrt(hidden)),
        # BatchNorm1d(64) params + running stats (nontrivial deterministic values)
        "g1": 1.0 + 0.1 * jax.random.normal(ks[6], (1, hidden), jnp.float32),
        "be1": 0.1 * jax.random.normal(ks[7], (1, hidden), jnp.float32),
        "m1": 0.1 * jax.random.normal(ks[8], (1, hidden), jnp.float32),
        "v1": jax.random.uniform(ks[9], (1, hidden), jnp.float32, 0.5, 1.5),
        "g2": 1.0 + 0.1 * jax.random.normal(ks[10], (1, hidden), jnp.float32),
        "be2": 0.1 * jax.random.normal(ks[11], (1, hidden), jnp.float32),
        "m2": 0.05 * jnp.ones((1, hidden), jnp.float32),
        "v2": 1.2 * jnp.ones((1, hidden), jnp.float32),
    }


if __name__ == "__main__":
    key = jax.random.PRNGKey(0)
    k_param, k_x = jax.random.split(key)

    batch = 8
    input_size = 32

    params = init_params(k_param, input_size)
    packed = pack_params(params, input_size)
    x = jax.random.normal(k_x, (batch, input_size), jnp.float32)

    out = jax.block_until_ready(book_classification_forward(x, packed))
    assert out.shape == (batch, NUM_CLASSES)

    # 1) exact-path check: same folded bf16 math in pure JAX
    ref_bf16 = folded_reference(x, packed)
    assert jnp.allclose(out, ref_bf16, atol=1e-3, rtol=1e-3), "mismatch vs folded bf16 reference"

    # 2) semantic check vs the original fp32 eval-mode module (loose tol for bf16 matmuls)
    ref_f32 = reference_forward(x, params)
    assert jnp.allclose(out, ref_f32, atol=5e-2, rtol=5e-2), "mismatch vs fp32 reference"

    print("KERNEL_OK")
</pallas_src>

<mosaic_0001>
module attributes {stable_mosaic.version = 11 : i64} {
  func.func @book_classification_kernel(%arg0: i32, %arg1: memref<8x32xf32, #tpu.memory_space<vmem>>, %arg2: memref<32x128xbf16, #tpu.memory_space<vmem>>, %arg3: memref<128x128xbf16, #tpu.memory_space<vmem>>, %arg4: memref<128x128xbf16, #tpu.memory_space<vmem>>, %arg5: memref<3x128xf32, #tpu.memory_space<vmem>>, %arg6: memref<8x8xf32, #tpu.memory_space<vmem>>) attributes {dimension_semantics = [#tpu.dimension_semantics<parallel>], iteration_bounds = array<i64: 1>, scalar_prefetch = 0 : i64, scratch_operands = 0 : i64, tpu.core_type = #tpu.core_type<tc>, window_params = [{transform_indices = @transform_0, window_bounds = array<i64: 8, 32>}, {pipeline_mode = #tpu.pipeline_mode<synchronous>, transform_indices = @transform_1, window_bounds = array<i64: 32, 128>}, {pipeline_mode = #tpu.pipeline_mode<synchronous>, transform_indices = @transform_2, window_bounds = array<i64: 128, 128>}, {pipeline_mode = #tpu.pipeline_mode<synchronous>, transform_indices = @transform_3, window_bounds = array<i64: 128, 128>}, {pipeline_mode = #tpu.pipeline_mode<synchronous>, transform_indices = @transform_4, window_bounds = array<i64: 3, 128>}, {transform_indices = @transform_5, window_bounds = array<i64: 8, 8>}]} {
    %c0 = arith.constant 0 : index
    %c0_0 = arith.constant 0 : index
    %0 = vector.load %arg5[%c0, %c0_0] : memref<3x128xf32, #tpu.memory_space<vmem>>, vector<3x128xf32>
    %1 = vector.extract_strided_slice %0 {offsets = [0, 0], sizes = [1, 128], strides = [1, 1]} : vector<3x128xf32> to vector<1x128xf32>
    %2 = vector.extract_strided_slice %0 {offsets = [1, 0], sizes = [1, 128], strides = [1, 1]} : vector<3x128xf32> to vector<1x128xf32>
    %3 = vector.extract_strided_slice %0 {offsets = [2, 0], sizes = [1, 128], strides = [1, 1]} : vector<3x128xf32> to vector<1x128xf32>
    %c0_1 = arith.constant 0 : index
    %c0_2 = arith.constant 0 : index
    %4 = vector.load %arg1[%c0_1, %c0_2] : memref<8x32xf32, #tpu.memory_space<vmem>>, vector<8x32xf32>
    %5 = arith.truncf %4 : vector<8x32xf32> to vector<8x32xbf16>
    %c0_3 = arith.constant 0 : index
    %c0_4 = arith.constant 0 : index
    %6 = vector.load %arg2[%c0_3, %c0_4] : memref<32x128xbf16, #tpu.memory_space<vmem>>, vector<32x128xbf16>
    %cst = arith.constant dense<0.000000e+00> : vector<8x128xf32>
    %7 = tpu.matmul %5, %6, %cst {dimension_numbers = #tpu.dot_dimension_numbers<[1], [0], [0], [1], [0, 0, 1, 1], [], []>} : vector<8x32xbf16>, vector<32x128xbf16>, vector<8x128xf32> -> vector<8x128xf32>
    %8 = vector.broadcast %1 : vector<1x128xf32> to vector<8x128xf32>
    %9 = arith.addf %7, %8 : vector<8x128xf32>
    %cst_5 = arith.constant 0.000000e+00 : f32
    %10 = vector.broadcast %cst_5 : f32 to vector<8x128xf32>
    %11 = arith.maximumf %9, %10 : vector<8x128xf32>
    %12 = arith.truncf %11 : vector<8x128xf32> to vector<8x128xbf16>
    %c0_6 = arith.constant 0 : index
    %c0_7 = arith.constant 0 : index
    %13 = vector.load %arg3[%c0_6, %c0_7] : memref<128x128xbf16, #tpu.memory_space<vmem>>, vector<128x128xbf16>
    %cst_8 = arith.constant dense<0.000000e+00> : vector<8x128xf32>
    %14 = tpu.matmul %12, %13, %cst_8 {dimension_numbers = #tpu.dot_dimension_numbers<[1], [0], [0], [1], [0, 0, 1, 1], [], []>} : vector<8x128xbf16>, vector<128x128xbf16>, vector<8x128xf32> -> vector<8x128xf32>
    %15 = vector.broadcast %2 : vector<1x128xf32> to vector<8x128xf32>
    %16 = arith.addf %14, %15 : vector<8x128xf32>
    %cst_9 = arith.constant 0.000000e+00 : f32
    %17 = vector.broadcast %cst_9 : f32 to vector<8x128xf32>
    %18 = arith.maximumf %16, %17 : vector<8x128xf32>
    %19 = arith.truncf %18 : vector<8x128xf32> to vector<8x128xbf16>
    %c0_10 = arith.constant 0 : index
    %c0_11 = arith.constant 0 : index
    %20 = vector.load %arg4[%c0_10, %c0_11] : memref<128x128xbf16, #tpu.memory_space<vmem>>, vector<128x128xbf16>
    %cst_12 = arith.constant dense<0.000000e+00> : vector<8x128xf32>
    %21 = tpu.matmul %19, %20, %cst_12 {dimension_numbers = #tpu.dot_dimension_numbers<[1], [0], [0], [1], [0, 0, 1, 1], [], []>} : vector<8x128xbf16>, vector<128x128xbf16>, vector<8x128xf32> -> vector<8x128xf32>
    %22 = vector.broadcast %3 : vector<1x128xf32> to vector<8x128xf32>
    %23 = arith.addf %21, %22 : vector<8x128xf32>
    %24 = vector.extract_strided_slice %23 {offsets = [0, 0], sizes = [8, 8], strides = [1, 1]} : vector<8x128xf32> to vector<8x8xf32>
    %c0_13 = arith.constant 0 : index
    %c0_14 = arith.constant 0 : index
    %25 = vector.load %arg6[%c0_13, %c0_14] : memref<8x8xf32, #tpu.memory_space<vmem>>, vector<8x8xf32>
    tpu.vector_store %arg6[%c0_13, %c0_14], %24 {strides = array<i32>} : memref<8x8xf32, #tpu.memory_space<vmem>>, vector<8x8xf32>,
    return
  }
  func.func @transform_0(%arg0: i32) -> (i32, i32) {
    %c0_i32 = arith.constant 0 : i32
    %c0_i32_0 = arith.constant 0 : i32
    return %arg0, %c0_i32 : i32, i32
  }
  func.func @transform_1(%arg0: i32) -> (i32, i32) {
    %c0_i32 = arith.constant 0 : i32
    %c0_i32_0 = arith.constant 0 : i32
    %c0_i32_1 = arith.constant 0 : i32
    return %c0_i32, %c0_i32_0 : i32, i32
  }
  func.func @transform_2(%arg0: i32) -> (i32, i32) {
    %c0_i32 = arith.constant 0 : i32
    %c0_i32_0 = arith.constant 0 : i32
    %c0_i32_1 = arith.constant 0 : i32
    return %c0_i32, %c0_i32_0 : i32, i32
  }
  func.func @transform_3(%arg0: i32) -> (i32, i32) {
    %c0_i32 = arith.constant 0 : i32
    %c0_i32_0 = arith.constant 0 : i32
    %c0_i32_1 = arith.constant 0 : i32
    return %c0_i32, %c0_i32_0 : i32, i32
  }
  func.func @transform_4(%arg0: i32) -> (i32, i32) {
    %c0_i32 = arith.constant 0 : i32
    %c0_i32_0 = arith.constant 0 : i32
    %c0_i32_1 = arith.constant 0 : i32
    return %c0_i32, %c0_i32_0 : i32, i32
  }
  func.func @transform_5(%arg0: i32) -> (i32, i32) {
    %c0_i32 = arith.constant 0 : i32
    %c0_i32_0 = arith.constant 0 : i32
    return %arg0, %c0_i32 : i32, i32
  }
}

</mosaic_0001>

<bundles_post_ra>
// kernel: tpu_custom_call.1
= control target key start
LH: loop header
LB: loop body
LE: loop exit
PB: predicated region body
PF: predicated region fallthrough
CT: control target
= control target key end

     0   :  { %10 = vsyncpa [#allocation3], 0  ;;  %s749_s0 = inlined_call_operand.hbm [shape: f32[8,32], index: 0, kind: input, shape index: {}]   ;;  %s750_s1 = inlined_call_operand.hbm [shape: bf16[32,128], index: 1, kind: input, shape index: {}]   ;;  %s751_s2 = inlined_call_operand.hbm [shape: bf16[128,128], index: 2, kind: input, shape index: {}]   ;;  %s752_s3 = inlined_call_operand.hbm [shape: bf16[128,128], index: 3, kind: input, shape index: {}]   ;;  %s753_s4 = inlined_call_operand.vmem [shape: f32[3,128], index: 4, kind: input, shape index: {}]   ;;  %s754_s5 = inlined_call_operand.hbm [shape: f32[8,8], index: 5, kind: output, shape index: {}]  }
   0x1   :  { %11 = vsyncpa [#allocation6], 0 }
   0x2   :  { %12 = vsyncpa [#allocation9], 0 }
   0x3   :  { %13 = vsyncpa [#allocation4], 0  ;;  %s614_s18 = smov [#allocation5]   ;;  %s496_s22 = scalar_lea.hbm %s750_s1, 256 }
   0x4   :  { %s29_s19 = sshll.u32 %s614_s18, 4  ;;  %p497_p0 = scmp.ne.s32.totalorder %s750_s1, %s496_s22  ;;  %s30_s19 = int_to_ptr.vmem [resolvable:$true] %s29_s19 }
   0x5   :  { %p500_p1 = scmp.lt.u32.totalorder %s496_s22, %s750_s1 }
   0x7   :  { %p502_p2 = pnand %p500_p1, %p497_p0 }
   0x9   :  { %505 = shalt.err (!%p502_p2)
}
   0xa   :  { %s506_s27 = scalar_lea.vmem %s30_s19, 256  ;;  %p511_p4 = scmp.lt.s32.totalorder %s30_s19, %s30_s19 }
   0xb   :  { %p507_p3 = scmp.ne.s32.totalorder %s30_s19, %s506_s27  ;;  %p512_p5 = scmp.lt.s32.totalorder %s506_s27, %s506_s27 }
   0xd   :  { %p513_p6 = por %p512_p5, %p511_p4 }
   0xf   :  { %p514_p7 = pnand %p513_p6, %p507_p3 }
  0x11   :  { %517 = shalt.err (!%p514_p7)
}
  0x12   :  { %s615_s28 = smov 64   ;;  %s616_s29 = smov 4  }
  0x13   :  { %35 = dma.hbm_to_vmem [thread:$0]  %s750_s1, 256, %s30_s19, [#allocation6], %s615_s28, %s615_s28, %s616_s29  }
  0x14   :  { %s617_s7 = smov [#allocation2]   ;;  %s618_s9 = smov [#allocation7]  }
  0x15   :  { %s20_s8 = sshll.u32 %s617_s7, 4  ;;  %s41_s10 = sshll.u32 %s618_s9, 4  ;;  %s21_s8 = int_to_ptr.vmem [resolvable:$true] %s20_s8  ;;  %s42_s10 = int_to_ptr.vmem [resolvable:$true] %s41_s10 }
  0x16   :  { %s518_s13 = scalar_lea.hbm %s749_s0, 128 }
  0x17   :  { %p519_p8 = scmp.ne.s32.totalorder %s749_s0, %s518_s13  ;;  %p522_p9 = scmp.lt.u32.totalorder %s518_s13, %s749_s0 }
  0x19   :  { %p524_p10 = pnand %p522_p9, %p519_p8 }
  0x1b   :  { %527 = shalt.err (!%p524_p10)
}
  0x1c   :  { %s528_s1 = scalar_lea.vmem %s21_s8, 128  ;;  %p533_p12 = scmp.lt.s32.totalorder %s21_s8, %s21_s8 }
  0x1d   :  { %p529_p11 = scmp.ne.s32.totalorder %s21_s8, %s528_s1  ;;  %p534_p13 = scmp.lt.s32.totalorder %s528_s1, %s528_s1 }
  0x1f   :  { %p535_p0 = por %p534_p13, %p533_p12 }
  0x21   :  { %p536_p1 = pnand %p535_p0, %p529_p11 }
  0x23   :  { %539 = shalt.err (!%p536_p1)
}
  0x24   :  { %23 = dma.hbm_to_vmem [thread:$0]  %s749_s0, 128, %s21_s8, [#allocation3]  }
  0x25   :  { %s540_s22 = scalar_lea.hbm %s751_s2, 1024 }
  0x26   :  { %p541_p2 = scmp.ne.s32.totalorder %s751_s2, %s540_s22  ;;  %p544_p3 = scmp.lt.u32.totalorder %s540_s22, %s751_s2 }
  0x28   :  { %p546_p4 = pnand %p544_p3, %p541_p2 }
  0x2a   :  { %549 = shalt.err (!%p546_p4)
}
  0x2b   :  { %s550_s27 = scalar_lea.vmem %s42_s10, 1024  ;;  %p555_p6 = scmp.lt.s32.totalorder %s42_s10, %s42_s10 }
  0x2c   :  { %p551_p5 = scmp.ne.s32.totalorder %s42_s10, %s550_s27  ;;  %p556_p7 = scmp.lt.s32.totalorder %s550_s27, %s550_s27 }
  0x2e   :  { %p557_p8 = por %p556_p7, %p555_p6 }
  0x30   :  { %p558_p9 = pnand %p557_p8, %p551_p5 }
  0x32   :  { %561 = shalt.err (!%p558_p9)
}
  0x33   :  { %47 = dma.hbm_to_vmem [thread:$0]  %s751_s2, 1024, %s42_s10, [#allocation6], %s615_s28, %s615_s28, %s616_s29  }
  0x34   :  { %s619_s6 = smov [#allocation8]   ;;  %s562_s11 = scalar_lea.hbm %s752_s3, 1024 }
  0x35   :  { %s53_s7 = sshll.u32 %s619_s6, 4  ;;  %p563_p10 = scmp.ne.s32.totalorder %s752_s3, %s562_s11  ;;  %s54_s7 = int_to_ptr.vmem [resolvable:$true] %s53_s7 }
  0x36   :  { %p566_p11 = scmp.lt.u32.totalorder %s562_s11, %s752_s3 }
  0x38   :  { %p568_p12 = pnand %p566_p11, %p563_p10 }
  0x3a   :  { %571 = shalt.err (!%p568_p12)
}
  0x3b   :  { %s572_s16 = scalar_lea.vmem %s54_s7, 1024  ;;  %p577_p0 = scmp.lt.s32.totalorder %s54_s7, %s54_s7 }
  0x3c   :  { %p573_p13 = scmp.ne.s32.totalorder %s54_s7, %s572_s16  ;;  %p578_p1 = scmp.lt.s32.totalorder %s572_s16, %s572_s16 }
  0x3e   :  { %p579_p2 = por %p578_p1, %p577_p0 }
  0x40   :  { %p580_p3 = pnand %p579_p2, %p573_p13 }
  0x42   :  { %583 = shalt.err (!%p580_p3)
}
  0x43   :  { %59 = dma.hbm_to_vmem [thread:$0]  %s752_s3, 1024, %s54_s7, [#allocation9], %s615_s28, %s615_s28, %s616_s29  }
  0x44   :  { %606 = dma.done.wait [#allocation3], 128  }
  0x45   :  { %607 = vsyncadd [#allocation3], 4294967168 }
  0x46   :  { %608 = dma.done.wait [#allocation6], 1280  }
  0x47   :  { %609 = vsyncadd [#allocation6], 4294966016 }
  0x48   :  { %610 = dma.done.wait [#allocation9], 1024  }
  0x49   :  { %611 = vsyncadd [#allocation9], 4294966272  ;;  %v620_v0 = vmov 0.0   ;;  %vm621_vm0 = vmmov 0   ;;  %v478_v1 = vld [vmem:[#allocation5] sm:$0xff]   ;;  %v479_v2 = vld [vmem:[#allocation5 + $0x8] sm:$0xff]   ;;  %v82_v19 = vlaneseq }
  0x4a   :  { %421 = vmatprep.subr.bf16.mxu0 %v620_v0  ;;  %425 = vmatprep.mubr.msk.bf16.mxu0 %vm621_vm0, %v620_v0  ;;  %v76_v3 = vld [vmem:[#allocation2] sm:$0xff]  ;;  %v480_v4 = vld [vmem:[#allocation7] sm:$0xff]   ;;  %vm98_vm1 = vcmask 261120   ;;  %v482_v7 = vld [vmem:[#allocation7 + $0x10] sm:$0xff]   ;;  %vm362_vm2 = vcmask 64512  }
  0x4b   :  { %429 = vmatprep.subr.bf16.mxu1 %v620_v0  ;;  %445 = vmatprep.mubr.msk.bf16.mxu1 %vm621_vm0, %v620_v0  ;;  %v77_v5 = vpack.c.bf16 %v76_v3, %v76_v3  ;;  %v481_v6 = vld [vmem:[#allocation7 + $0x8] sm:$0xff]   ;;  %v483_v8 = vld [vmem:[#allocation7 + $0x18] sm:$0xff]   ;;  %v484_v9 = vld [vmem:[#allocation7 + $0x20] sm:$0xff]   ;;  %v83_v20 = vshrl.u32 %v82_v19, 7 }
  0x4c   :  { %422 = vmatpush3.bf16.msra.mxu0 %v478_v1  ;;  %430 = vmatpush3.bf16.msra.mxu1 %v480_v4  ;;  %v485_v10 = vld [vmem:[#allocation7 + $0x28] sm:$0xff]   ;;  %v486_v11 = vld [vmem:[#allocation7 + $0x30] sm:$0xff]   ;;  %v487_v12 = vld [vmem:[#allocation7 + $0x38] sm:$0xff]  }
  0x4d   :  { %423 = vmatprep.subr.bf16.mxu0 %v620_v0  ;;  %431 = vmatprep.subr.bf16.mxu1 %v620_v0  ;;  %v488_v13 = vld [vmem:[#allocation8] sm:$0xff]   ;;  %v489_v14 = vld [vmem:[#allocation8 + $0x8] sm:$0xff]   ;;  %v490_v15 = vld [vmem:[#allocation8 + $0x10] sm:$0xff]   ;;  %v84_v21 = vsub.s32 0, %v83_v20  ;;  %v162_v33 = vsub.s32 1, %v83_v20  ;;  %v272_v42 = vsub.s32 2, %v83_v20 }
  0x4e   :  { %v491_v16 = vld [vmem:[#allocation8 + $0x18] sm:$0xff]   ;;  %v492_v17 = vld [vmem:[#allocation8 + $0x20] sm:$0xff]   ;;  %v493_v18 = vld [vmem:[#allocation8 + $0x28] sm:$0xff]  }
  0x4f   :  { %v75_v22 = vld [vmem:[%s753_s4] sm:$0x7]  ;;  %v494_v31 = vld [vmem:[#allocation8 + $0x30] sm:$0xff]   ;;  %v495_v32 = vld [vmem:[#allocation8 + $0x38] sm:$0xff]   ;;  %s622_s4 = smov [#allocation10]  }
  0x50   :  { %424 = vmatpush3.bf16.msra.mxu0 %v479_v2  ;;  %432 = vmatpush3.bf16.msra.mxu1 %v481_v6  ;;  %v85_v23 = vrot.slane %v75_v22, %v84_v21  ;;  %v163_v34 = vrot.slane %v75_v22, %v162_v33  ;;  %v273_v43 = vrot.slane %v75_v22, %v272_v42  ;;  %s370_s29 = sshll.u32 %s622_s4, 4  ;;  %s371_s29 = int_to_ptr.vmem [resolvable:$true] %s370_s29 }
  0x51   :  { %449 = vmatprep.subr.bf16.mxu0 %v620_v0  ;;  %433 = vmatprep.subr.bf16.mxu1 %v620_v0  ;;  %s584_s17 = scalar_lea.vmem %s371_s29, 128  ;;  %p589_p5 = scmp.lt.s32.totalorder %s371_s29, %s371_s29 }
  0x52   :  { %p585_p4 = scmp.ne.s32.totalorder %s371_s29, %s584_s17  ;;  %p590_p6 = scmp.lt.s32.totalorder %s584_s17, %s584_s17 }
  0x53   :  { %426 = vmatmul.mubr.msk.bf16.vlgmr.msra.gmra.mrb[0].mxu0 %vm98_vm1, %v77_v5 }
  0x54   :  { %465 = vmatprep.mubr.msk.bf16.mxu0 %vm621_vm0, %v620_v0  ;;  %434 = vmatpush3.bf16.msra.mxu1 %v482_v7  ;;  %p591_p7 = por %p590_p6, %p589_p5 }
  0x55   :  { %435 = vmatprep.subr.bf16.mxu1 %v620_v0  ;;  %450 = vmatpush3.bf16.msra.mxu0 %v488_v13 }
  0x56   :  { %451 = vmatprep.subr.bf16.mxu0 %v620_v0  ;;  %p592_p8 = pnand %p591_p7, %p585_p4 }
  0x58   :  { %436 = vmatpush3.bf16.msra.mxu1 %v483_v8 }
  0x59   :  { %437 = vmatprep.subr.bf16.mxu1 %v620_v0  ;;  %452 = vmatpush3.bf16.msra.mxu0 %v489_v14 }
  0x5a   :  { %453 = vmatprep.subr.bf16.mxu0 %v620_v0 }
  0x5c   :  { %438 = vmatpush3.bf16.msra.mxu1 %v484_v9 }
  0x5d   :  { %439 = vmatprep.subr.bf16.mxu1 %v620_v0  ;;  %454 = vmatpush3.bf16.msra.mxu0 %v490_v15 }
  0x5e   :  { %455 = vmatprep.subr.bf16.mxu0 %v620_v0 }
  0x60   :  { %440 = vmatpush3.bf16.msra.mxu1 %v485_v10 }
  0x61   :  { %441 = vmatprep.subr.bf16.mxu1 %v620_v0  ;;  %456 = vmatpush3.bf16.msra.mxu0 %v491_v16 }
  0x62   :  { %457 = vmatprep.subr.bf16.mxu0 %v620_v0 }
  0x64   :  { %442 = vmatpush3.bf16.msra.mxu1 %v486_v11 }
  0x65   :  { %443 = vmatprep.subr.bf16.mxu1 %v620_v0  ;;  %458 = vmatpush3.bf16.msra.mxu0 %v492_v17 }
  0x66   :  { %459 = vmatprep.subr.bf16.mxu0 %v620_v0 }
  0x68   :  { %444 = vmatpush3.bf16.msra.mxu1 %v487_v12 }
  0x69   :  { %460 = vmatpush3.bf16.msra.mxu0 %v493_v18 }
  0x6a   :  { %461 = vmatprep.subr.bf16.mxu0 %v620_v0 }
  0x6d   :  { %462 = vmatpush3.bf16.msra.mxu0 %v494_v31 }
  0x6e   :  { %463 = vmatprep.subr.bf16.mxu0 %v620_v0 }
  0x71   :  { %464 = vmatpush3.bf16.msra.mxu0 %v495_v32 }
 0x126   :  { %v136_v24 = vpop.f32.mrb[0].mxu0 }
 0x127   :  { %v137_v25 = vadd.f32 %v136_v24, %v85_v23  ;;  %v427_v26 = vpop.f32.mrb[1].mxu0 }
 0x128   :  { %v139_v27 = vpop.f32.mrb[2].mxu0 }
 0x129   :  { %v142_v28 = vmax.f32 %v137_v25, 0.0  ;;  %v428_v29 = vpop.f32.mrb[3].mxu0 }
 0x12b   :  { %v143_v30 = vpack.c.bf16 %v142_v28, %v142_v28 }
 0x12d   :  { %446 = vmatmul.mubr.bf16.vlgmr.msra.gmra.mrb[0].mxu1 %v143_v30 }
 0x200   :  { %v246_v35 = vpop.f32.mrb[0].mxu1 }
 0x201   :  { %v247_v36 = vadd.f32 %v246_v35, %v163_v34  ;;  %v447_v37 = vpop.f32.mrb[1].mxu1 }
 0x202   :  { %v249_v38 = vpop.f32.mrb[2].mxu1 }
 0x203   :  { %v252_v39 = vmax.f32 %v247_v36, 0.0  ;;  %v448_v40 = vpop.f32.mrb[3].mxu1 }
 0x205   :  { %v253_v41 = vpack.c.bf16 %v252_v39, %v252_v39 }
 0x207   :  { %466 = vmatmul.mubr.bf16.vlgmr.msra.gmra.mrb[4].mxu0 %v253_v41 }
 0x2da   :  { %v356_v44 = vpop.f32.mrb[4].mxu0 }
 0x2db   :  { %v357_v45 = vadd.f32 %v356_v44, %v273_v43  ;;  %v467_v46 = vpop.f32.mrb[5].mxu0 }
 0x2dc   :  { %v359_v47 = vpop.f32.mrb[6].mxu0 }
 0x2dd   :  { %v468_v48 = vpop.f32.mrb[7].mxu0  ;;  %363 = vst.msk [vmem:[#allocation10] sm:$0xff] %vm362_vm2, %v357_v45 }
 0x2de   :  { %595 = shalt.err (!%p592_p8)
}
 0x2df   :  { %s596_s19 = scalar_lea.hbm %s754_s5, 128 }
 0x2e0   :  { %p597_p9 = scmp.ne.s32.totalorder %s754_s5, %s596_s19  ;;  %p600_p10 = scmp.lt.u32.totalorder %s596_s19, %s754_s5 }
 0x2e2   :  { %p602_p11 = pnand %p600_p10, %p597_p9 }
 0x2e4   :  { %605 = shalt.err (!%p602_p11)
}
 0x2e5   :  { %373 = dma.vmem_to_hbm [thread:$0]  %s371_s29, 128, %s754_s5, [#allocation4]  }
 0x2e6   :  { %612 = dma.done.wait [#allocation4], 128  }
 0x2e7   :  { %613 = vsyncadd [#allocation4], 4294967168 }
 0x2e8   :  { %377 = vsyncpa [#allocation3], 1 }
 0x2e9   :  { %378 = vsyncpa [#allocation6], 1 }
 0x2ea   :  { %379 = vsyncpa [#allocation9], 1 }
 0x2eb   :  { %380 = vsyncpa [#allocation4], 1 }

</bundles_post_ra>
